<compile_context>
chip_gen: v6e
topology: v6e:2x2x1
jax: 0.10.0
libtpu: 0.0.40
codegen_flags: <defaults>
</compile_context>

<pallas_src>
import jax
import jax.numpy as jnp
from jax.experimental import pallas as pl
from jax.experimental.pallas import tpu as pltpu


_LANE = 128
_TARGET_STEP_BYTES = 16 * 1024 * 1024   # ~16 MiB of x streamed per grid step


def _round_up(v: int, m: int) -> int:
    return (v + m - 1) // m * m


def _vmem_capacity_bytes() -> int:
    try:
        cap = getattr(pltpu.get_tpu_info(), "vmem_capacity_bytes", None)
        if cap:
            return int(cap)
    except Exception:
        pass
    return 64 * 1024 * 1024   # conservative (v7x per-TensorCore)


def _choose_tiling(n: int, d: int, itemsize: int):
    """Return (tile_n, tile_k, vmem_limit_bytes)."""
    cap = _vmem_capacity_bytes()
    vmem_limit = max(32 * 1024 * 1024, (cap * 3) // 4)   # 96 MiB on 128 MiB parts, 48 MiB on v7x
    x_budget = vmem_limit // 2                            # for the double-buffered x tiles
    d_lanes = _round_up(d, _LANE)                         # VMEM pads the lane dim to 128
    row_bytes = d_lanes * itemsize

    if 2 * _LANE * row_bytes <= x_budget:
        # D fits whole inside a row tile: size tile_n by HBM bytes per step.
        tile_k = d
        if n < _LANE:
            tile_n = n                                    # exact block == full array dims
        else:
            by_target = max(_LANE, (_TARGET_STEP_BYTES // row_bytes) // _LANE * _LANE)
            by_budget = max(_LANE, (x_budget // (2 * row_bytes)) // _LANE * _LANE)
            n_lanes = _round_up(n, _LANE)
            tile_n = min(by_target, by_budget, n_lanes)
            if n_lanes >= 2 * _LANE:                      # keep >=2 tiles (v7x: 2 TensorCores)
                tile_n = min(tile_n, _round_up(pl.cdiv(n_lanes, 2), _LANE))
    else:
        # Huge D: K-tile the reduction so double-buffered x stays inside the budget.
        tile_n = min(_LANE, n)
        tile_k = max(_LANE, (x_budget // (2 * _LANE * itemsize)) // _LANE * _LANE)
        tile_k = min(tile_k, d_lanes)
    return tile_n, tile_k, vmem_limit


def _make_kernel(d: int, tile_k: int, num_k: int):
    needs_k_mask = (num_k > 1) and (d % tile_k != 0)

    def kernel(x_ref, w_ref, b_ref, o_ref, acc_ref):
        k = pl.program_id(1)

        @pl.when(k == 0)
        def _():
            acc_ref[...] = jnp.zeros_like(acc_ref)

        x = x_ref[...]
        if needs_k_mask:
            # Ragged last K block: lanes beyond D hold undefined VMEM data -> zero them.
            lane = jax.lax.broadcasted_iota(jnp.int32, x.shape, 1)
            x = jnp.where(k * tile_k + lane < d, x, 0).astype(x.dtype)

        # w[1, tk] . x[tn, tk]^T -> lane-dense (1, tn) partial logits on the MXU.
        acc_ref[...] += jax.lax.dot_general(
            w_ref[...], x,
            dimension_numbers=(((1,), (1,)), ((), ())),
            preferred_element_type=jnp.float32,
        )

        @pl.when(k == num_k - 1)
        def _():
            o_ref[...] = (acc_ref[...] + b_ref[0]).astype(o_ref.dtype)[None]

    return kernel


def logistic_regression_forward(x, weight, bias):
    """x: (..., D), weight: (1, D), bias: (1,) -> logits with torch's .squeeze() semantics."""
    x = jnp.asarray(x)
    if x.dtype not in (jnp.float32, jnp.bfloat16):
        x = x.astype(jnp.float32)
    weight = jnp.asarray(weight).reshape(1, -1).astype(x.dtype)   # match x for clean MXU lowering
    bias = jnp.asarray(bias, jnp.float32).reshape(1)

    lead_shape = x.shape[:-1]
    d = x.shape[-1]
    x2 = x.reshape(-1, d)
    n = x2.shape[0]

    tile_n, tile_k, vmem_limit = _choose_tiling(n, d, x2.dtype.itemsize)
    num_n = pl.cdiv(n, tile_n)
    num_k = pl.cdiv(d, tile_k)

    if num_k > 1:
        # Zero-pad the (tiny) weight so every K block of w is fully valid.
        d_pad = num_k * tile_k
        weight = jnp.pad(weight, ((0, 0), (0, d_pad - d)))

    kernel = _make_kernel(d, tile_k, num_k)

    out = pl.pallas_call(
        kernel,
        out_shape=jax.ShapeDtypeStruct((num_n, 1, tile_n), jnp.float32),
        grid=(num_n, num_k),
        in_specs=[
            pl.BlockSpec((tile_n, tile_k), lambda i, k: (i, k)),   # pipelined x tile
            pl.BlockSpec((1, tile_k), lambda i, k: (0, k)),        # weight slice (VMEM resident)
            pl.BlockSpec(memory_space=pltpu.SMEM),                 # bias scalar
        ],
        out_specs=pl.BlockSpec((1, 1, tile_n), lambda i, k: (i, 0, 0)),  # lane-dense logits row
        scratch_shapes=[pltpu.VMEM((1, tile_n), jnp.float32)],           # f32 accumulator
        compiler_params=pltpu.CompilerParams(
            dimension_semantics=("parallel", "arbitrary"),
            vmem_limit_bytes=vmem_limit,
        ),
        cost_estimate=pl.CostEstimate(
            flops=2 * n * d,
            transcendentals=0,
            bytes_accessed=n * d * x2.dtype.itemsize
            + num_n * tile_n * 4
            + weight.size * weight.dtype.itemsize,
        ),
    )(x2, weight, bias)

    logits = out.reshape(-1)[:n].reshape(lead_shape)
    # torch .squeeze() drops ALL size-1 dims (N == 1 -> 0-d scalar).
    return jnp.squeeze(logits)


if __name__ == "__main__":
    key = jax.random.PRNGKey(0)
    kx, kw, kb, kx2 = jax.random.split(key, 4)

    # Small shapes consistent with the module: batch=8, num_dim=32.
    N, D = 8, 32
    x = jax.random.normal(kx, (N, D), dtype=jnp.float32)

    # Deterministic init mimicking nn.Linear's uniform(-1/sqrt(D), 1/sqrt(D)).
    bound = 1.0 / jnp.sqrt(jnp.float32(D))
    weight = jax.random.uniform(kw, (1, D), minval=-bound, maxval=bound, dtype=jnp.float32)
    bias = jax.random.uniform(kb, (1,), minval=-bound, maxval=bound, dtype=jnp.float32)

    logits = logistic_regression_forward(x, weight, bias)
    jax.block_until_ready(logits)

    ref = (x @ weight.T + bias).squeeze()
    assert logits.shape == (N,)
    assert jnp.allclose(logits, ref, atol=1e-5, rtol=1e-5), \
        f"max abs err = {jnp.max(jnp.abs(logits - ref))}"

    # Extra check: ragged batch (> 1 row tile, partial last block, no padding pass).
    N2 = 200
    x2 = jax.random.normal(kx2, (N2, D), dtype=jnp.float32)
    logits2 = logistic_regression_forward(x2, weight, bias)
    jax.block_until_ready(logits2)
    ref2 = (x2 @ weight.T + bias).squeeze()
    assert logits2.shape == (N2,)
    assert jnp.allclose(logits2, ref2, atol=1e-5, rtol=1e-5), \
        f"max abs err = {jnp.max(jnp.abs(logits2 - ref2))}"

    print("KERNEL_OK")
</pallas_src>

<mosaic_0001>
module attributes {stable_mosaic.version = 11 : i64} {
  func.func @kernel(%arg0: i32, %arg1: i32, %arg2: memref<8x32xf32, #tpu.memory_space<vmem>>, %arg3: memref<1x32xf32, #tpu.memory_space<vmem>>, %arg4: memref<1xf32, #tpu.memory_space<smem>>, %arg5: memref<1x1x8xf32, #tpu.memory_space<vmem>>, %arg6: memref<1x8xf32, #tpu.memory_space<vmem>>) attributes {dimension_semantics = [#tpu.dimension_semantics<parallel>, #tpu.dimension_semantics<arbitrary>], iteration_bounds = array<i64: 1, 1>, scalar_prefetch = 0 : i64, scratch_operands = 1 : i64, tpu.core_type = #tpu.core_type<tc>, window_params = [{transform_indices = @transform_0, window_bounds = array<i64: 8, 32>}, {transform_indices = @transform_1, window_bounds = array<i64: 1, 32>}, {transform_indices = @transform_2, window_bounds = array<i64: 1>}, {transform_indices = @transform_3, window_bounds = array<i64: 1, 1, 8>}]} {
    %c0_i32 = arith.constant 0 : i32
    %0 = arith.cmpi eq, %arg1, %c0_i32 : i32
    %1 = arith.extui %0 : i1 to i32
    %c0_i32_0 = arith.constant 0 : i32
    %2 = arith.cmpi ne, %1, %c0_i32_0 : i32
    scf.if %2 {
      %cst_10 = arith.constant 0.000000e+00 : f32
      %12 = vector.broadcast %cst_10 : f32 to vector<1x8xf32>
      %c0_11 = arith.constant 0 : index
      %c0_12 = arith.constant 0 : index
      %13 = vector.load %arg6[%c0_11, %c0_12] : memref<1x8xf32, #tpu.memory_space<vmem>>, vector<1x8xf32>
      tpu.vector_store %arg6[%c0_11, %c0_12], %12 {strides = array<i32>} : memref<1x8xf32, #tpu.memory_space<vmem>>, vector<1x8xf32>,
    } else {
    }
    %c0 = arith.constant 0 : index
    %c0_1 = arith.constant 0 : index
    %3 = vector.load %arg2[%c0, %c0_1] : memref<8x32xf32, #tpu.memory_space<vmem>>, vector<8x32xf32>
    %c0_2 = arith.constant 0 : index
    %c0_3 = arith.constant 0 : index
    %4 = vector.load %arg6[%c0_2, %c0_3] : memref<1x8xf32, #tpu.memory_space<vmem>>, vector<1x8xf32>
    %c0_4 = arith.constant 0 : index
    %c0_5 = arith.constant 0 : index
    %5 = vector.load %arg3[%c0_4, %c0_5] : memref<1x32xf32, #tpu.memory_space<vmem>>, vector<1x32xf32>
    %cst = arith.constant dense<0.000000e+00> : vector<1x8xf32>
    %6 = tpu.matmul %5, %3, %cst {dimension_numbers = #tpu.dot_dimension_numbers<[1], [1], [0], [0], [0, 0, 1, 0], [], []>} : vector<1x32xf32>, vector<8x32xf32>, vector<1x8xf32> -> vector<1x8xf32>
    %7 = arith.addf %4, %6 : vector<1x8xf32>
    %c0_6 = arith.constant 0 : index
    %c0_7 = arith.constant 0 : index
    %8 = vector.load %arg6[%c0_6, %c0_7] : memref<1x8xf32, #tpu.memory_space<vmem>>, vector<1x8xf32>
    tpu.vector_store %arg6[%c0_6, %c0_7], %7 {strides = array<i32>} : memref<1x8xf32, #tpu.memory_space<vmem>>, vector<1x8xf32>,
    %c0_i32_8 = arith.constant 0 : i32
    %9 = arith.cmpi eq, %arg1, %c0_i32_8 : i32
    %10 = arith.extui %9 : i1 to i32
    %c0_i32_9 = arith.constant 0 : i32
    %11 = arith.cmpi ne, %10, %c0_i32_9 : i32
    scf.if %11 {
      %c0_10 = arith.constant 0 : index
      %c0_11 = arith.constant 0 : index
      %12 = vector.load %arg6[%c0_10, %c0_11] : memref<1x8xf32, #tpu.memory_space<vmem>>, vector<1x8xf32>
      %c0_12 = arith.constant 0 : index
      %13 = memref.load %arg4[%c0_12] : memref<1xf32, #tpu.memory_space<smem>>
      %14 = vector.broadcast %13 : f32 to vector<1x8xf32>
      %15 = arith.addf %12, %14 : vector<1x8xf32>
      %16 = vector.shape_cast %15 : vector<1x8xf32> to vector<1x1x8xf32>
      %c0_13 = arith.constant 0 : index
      %c0_14 = arith.constant 0 : index
      %c0_15 = arith.constant 0 : index
      %17 = vector.load %arg5[%c0_13, %c0_14, %c0_15] : memref<1x1x8xf32, #tpu.memory_space<vmem>>, vector<1x1x8xf32>
      tpu.vector_store %arg5[%c0_13, %c0_14, %c0_15], %16 {strides = array<i32>} : memref<1x1x8xf32, #tpu.memory_space<vmem>>, vector<1x1x8xf32>,
    } else {
    }
    return
  }
  func.func @transform_0(%arg0: i32, %arg1: i32) -> (i32, i32) {
    %c0_i32 = arith.constant 0 : i32
    return %arg0, %arg1 : i32, i32
  }
  func.func @transform_1(%arg0: i32, %arg1: i32) -> (i32, i32) {
    %c0_i32 = arith.constant 0 : i32
    %c0_i32_0 = arith.constant 0 : i32
    return %c0_i32, %arg1 : i32, i32
  }
  func.func @transform_2(%arg0: i32, %arg1: i32) -> i32 {
    %c0_i32 = arith.constant 0 : i32
    %c0_i32_0 = arith.constant 0 : i32
    return %c0_i32 : i32
  }
  func.func @transform_3(%arg0: i32, %arg1: i32) -> (i32, i32, i32) {
    %c0_i32 = arith.constant 0 : i32
    %c0_i32_0 = arith.constant 0 : i32
    %c0_i32_1 = arith.constant 0 : i32
    return %arg0, %c0_i32, %c0_i32_0 : i32, i32, i32
  }
}

</mosaic_0001>

<bundles_post_ra>
// kernel: tpu_custom_call.1
= control target key start
LH: loop header
LB: loop body
LE: loop exit
PB: predicated region body
PF: predicated region fallthrough
CT: control target
= control target key end

     0   :  { %9 = vsyncpa [#allocation5], 0  ;;  %s236_s0 = inlined_call_operand.hbm [shape: f32[8,32], index: 0, kind: input, shape index: {}]   ;;  %s237_s1 = inlined_call_operand.vmem [shape: f32[1,32], index: 1, kind: input, shape index: {}]   ;;  %s238_s2 = inlined_call_operand.<no memory space> [shape: f32[1], index: 2, kind: input, shape index: {}]   ;;  %s239_s3 = inlined_call_operand.hbm [shape: f32[1,1,8], index: 3, kind: output, shape index: {}]  }
   0x1   :  { %10 = vsyncpa [#allocation6], 0  ;;  %s197_s12 = smov [#allocation4]  }
   0x2   :  { %s17_s13 = sshll.u32 %s197_s12, 4  ;;  %s18_s13 = int_to_ptr.vmem [resolvable:$true] %s17_s13 }
   0x3   :  { %s161_s14 = scalar_lea.vmem %s18_s13, 128  ;;  %p166_p1 = scmp.lt.s32.totalorder %s18_s13, %s18_s13 }
   0x4   :  { %p162_p0 = scmp.ne.s32.totalorder %s18_s13, %s161_s14  ;;  %p167_p2 = scmp.lt.s32.totalorder %s161_s14, %s161_s14 }
   0x6   :  { %p168_p3 = por %p167_p2, %p166_p1 }
   0x8   :  { %p169_p4 = pnand %p168_p3, %p162_p0 }
   0xa   :  { %172 = shalt.err (!%p169_p4)
}
   0xb   :  { %20 = dma.hbm_to_vmem [thread:$0]  %s236_s0, 128, %s18_s13, [#allocation5]  }
   0xc   :  { %193 = dma.done.wait [#allocation5], 128  }
   0xd   :  { %194 = vsyncadd [#allocation5], 4294967168  ;;  %vm32_vm0 = vcmask 57344   ;;  %v198_v0 = vmov 0.0   ;;  %vm199_vm1 = vmmov 0   ;;  %vm37_vm2 = vcmask 261120  }
   0xe   :  { %33 = vst.msk [vmem:[#allocation2] sm:$0x1] %vm32_vm0, %v198_v0  ;;  %144 = vmatprep.subr.mxu0 %v198_v0  ;;  %146 = vmatprep.mubr.msk.f32.mxu0 %vm199_vm1, %v198_v0  ;;  %v34_v1 = vld [vmem:[#allocation4] sm:$0xff]  ;;  %v36_v2 = vld [vmem:[%s237_s1] sm:$0x1]  ;;  %v122_v7 = vstv %s238_s2  ;;  %s200_s20 = smov [#allocation7]  }
   0xf   :  { %145 = vmatpush3.xpose.msk.msra.mxu0 %vm37_vm2, %v34_v1  ;;  %s131_s21 = sshll.u32 %s200_s20, 4  ;;  %s132_s21 = int_to_ptr.vmem [resolvable:$true] %s131_s21 }
  0x10   :  { %s173_s22 = scalar_lea.vmem %s132_s21, 16  ;;  %s177_s1 = scalar_lea.vmem %s132_s21, 32 }
  0x11   :  { %p174_p5 = scmp.ne.s32.totalorder %s132_s21, %s173_s22  ;;  %p178_p6 = scmp.lt.s32.totalorder %s132_s21, %s132_s21 }
  0x12   :  { %147 = vmatmul.mubr.msk.f32.vlgmr.msra.gmra.mxu0 %vm37_vm2, %v36_v2  ;;  %p179_p7 = scmp.lt.s32.totalorder %s177_s1, %s173_s22 }
  0x14   :  { %p180_p8 = por %p179_p7, %p178_p6 }
  0x15   :  { %v35_v3 = vld [vmem:[#allocation2] sm:$0x1] }
  0x16   :  { %p181_p9 = pnand %p180_p8, %p174_p5 }
  0xd2   :  { %v110_v4 = vpop.f32.mrf.mxu0 }
  0xd3   :  { %v114_v5 = vadd.f32 %v110_v4, %v35_v3 }
  0xd4   :  { %v148_v6 = vpop.f32.mrf.mxu0 }
  0xd5   :  { %116 = vst.msk [vmem:[#allocation2] sm:$0x1] %vm32_vm0, %v114_v5 }
  0xdc   :  { %v120_v8 = vld [vmem:[#allocation2] sm:$0x1] }
  0xdd   :  { %v123_v9 = vadd.f32 %v122_v7, %v120_v8 }
  0xdf   :  { %124 = vst.msk [vmem:[#allocation7] sm:$0x1] %vm32_vm0, %v123_v9 }
  0xe0   :  { %184 = shalt.err (!%p181_p9)
}
  0xe1   :  { %134 = dma.vmem_to_hbm [thread:$0]  %s132_s21, 16, %s239_s3, [#allocation6]  }
  0xe2   :  { %195 = dma.done.wait [#allocation6], 16  }
  0xe3   :  { %196 = vsyncadd [#allocation6], 4294967280 }
  0xe4   :  { %138 = vsyncpa [#allocation5], 1 }
  0xe5   :  { %139 = vsyncpa [#allocation6], 1 }

</bundles_post_ra>
